<compile_context>
chip_gen: v6e
topology: v6e:2x2x1
jax: 0.10.0
libtpu: 0.0.40
codegen_flags: <defaults>
</compile_context>

<pallas_src>
import jax
import jax.numpy as jnp
from jax.experimental import pallas as pl
from jax.experimental.pallas import tpu as pltpu


LANE = 128
SUB_BF16 = 16  # native packed sublane tile for bf16 rows


def _round_up(n, m):
    return ((n + m - 1) // m) * m


def mlp_kernel(x_ref, w1_ref, b1_ref, w2_ref, b2_ref, w3_ref, b3_ref, o_ref):
    # x: (tile_b, in_p) bf16.  Weights (in_p, out_p) bf16, whole-array VMEM
    # residents.  Biases (1, out_p) f32.  f32 accumulation on the MXU.
    x = x_ref[...]

    h = jnp.dot(x, w1_ref[...], preferred_element_type=jnp.float32) + b1_ref[...]
    h = jnp.maximum(h, 0.0)  # ReLU (activ='relu')

    h = jnp.dot(h.astype(jnp.bfloat16), w2_ref[...],
                preferred_element_type=jnp.float32) + b2_ref[...]
    h = jnp.maximum(h, 0.0)  # ReLU

    # final LinearBlock: norm='none', activation='none'
    out = jnp.dot(h.astype(jnp.bfloat16), w3_ref[...],
                  preferred_element_type=jnp.float32) + b3_ref[...]
    o_ref[...] = out.astype(o_ref.dtype)


def prepare_mlp_params(params):
    """Pad + cast weights/biases once (hoisted out of the per-call path).

    params: [(w1,b1),(w2,b2),(w3,b3)] with w as (in,out) f32, b as (1,out) f32.
    (PyTorch checkpoints store w as (out,in): transpose before calling this.)
    Returns (padded_dict, dims) with dims = (in_dim, d1, d2, out_dim).
    """
    (w1, b1), (w2, b2), (w3, b3) = params
    in_dim, d1 = w1.shape
    d2 = w2.shape[1]
    out_dim = w3.shape[1]
    in_p, d1_p, d2_p, out_p = (_round_up(d, LANE)
                               for d in (in_dim, d1, d2, out_dim))

    def pad_w(w, r, c):
        return jnp.zeros((r, c), jnp.bfloat16).at[:w.shape[0], :w.shape[1]].set(
            w.astype(jnp.bfloat16))

    def pad_b(b, c):
        b = b.reshape(1, -1)
        return jnp.zeros((1, c), jnp.float32).at[:, :b.shape[1]].set(
            b.astype(jnp.float32))

    padded = dict(
        w1=pad_w(w1, in_p, d1_p), b1=pad_b(b1, d1_p),
        w2=pad_w(w2, d1_p, d2_p), b2=pad_b(b2, d2_p),
        w3=pad_w(w3, d2_p, out_p), b3=pad_b(b3, out_p),
    )
    return padded, (in_dim, d1, d2, out_dim)


def _vmem_budget_bytes():
    # Generation-aware budget: ~3/4 of physical VMEM (~96 MiB on v5e/v6e's
    # 128 MiB, ~48 MiB on v7x's 64 MiB).  Conservative fallback: 48 MiB.
    try:
        cap = pltpu.get_tpu_info().vmem_capacity_bytes
    except Exception:
        cap = 64 * 1024 * 1024
    return (cap * 3) // 4


def _pick_tile_b(B, in_p, d1_p, d2_p, out_p, out_bytes, vmem_budget):
    # Single-buffered residents (whole-array VMEM weights + biases).
    resident = (2 * (in_p * d1_p + d1_p * d2_p + d2_p * out_p)
                + 4 * (d1_p + d2_p + out_p))

    def footprint(tb):
        return (resident
                + 2 * tb * in_p * 2           # x tile, bf16, double-buffered
                + 2 * tb * out_p * out_bytes  # out tile, double-buffered
                + tb * (d1_p + d2_p) * 4      # f32 intermediates (approx)
                + tb * out_p * 4)             # f32 accumulator before store

    # Target >=2 grid steps (v7x megacore) with 16-aligned rows; cap at 512.
    tile_b = min(512, max(SUB_BF16, _round_up(pl.cdiv(B, 2), SUB_BF16)))
    while tile_b > SUB_BF16 and footprint(tile_b) > vmem_budget:
        tile_b = max(SUB_BF16, _round_up(tile_b // 2, SUB_BF16))
    return tile_b, footprint(tile_b)


def mlp_forward(x, padded, dims, *, force_pallas=False, out_dtype=jnp.float32):
    """x: NCHW (B,C,H,W) or already-flat (B, input_dim). Returns (B, out_dim)."""
    in_dim, d1, d2, out_dim = dims
    B = x.shape[0]
    x2 = x.reshape(B, -1)  # matches torch x.view(x.size(0), -1)
    assert x2.shape[1] == in_dim, (x2.shape, in_dim)

    # Small-shape fallback: padded-kernel overhead dwarfs the work; let XLA
    # handle it unless the caller forces the Pallas path.
    work = B * (in_dim * d1 + d1 * d2 + d2 * out_dim)
    if not force_pallas and work < (1 << 20):
        w1 = padded["w1"][:in_dim, :d1].astype(jnp.float32)
        w2 = padded["w2"][:d1, :d2].astype(jnp.float32)
        w3 = padded["w3"][:d2, :out_dim].astype(jnp.float32)
        h = jnp.maximum(x2 @ w1 + padded["b1"][:, :d1], 0.0)
        h = jnp.maximum(h @ w2 + padded["b2"][:, :d2], 0.0)
        return (h @ w3 + padded["b3"][:, :out_dim]).astype(out_dtype)

    w1p, b1p = padded["w1"], padded["b1"]
    w2p, b2p = padded["w2"], padded["b2"]
    w3p, b3p = padded["w3"], padded["b3"]
    in_p, d1_p = w1p.shape
    d2_p = w2p.shape[1]
    out_p = w3p.shape[1]

    out_bytes = jnp.dtype(out_dtype).itemsize
    vmem_budget = _vmem_budget_bytes()
    tile_b, fp = _pick_tile_b(B, in_p, d1_p, d2_p, out_p, out_bytes, vmem_budget)

    B_p = _round_up(B, tile_b)
    grid = (B_p // tile_b,)

    # Single padding/cast pass over x (fuses with neighbours under jit).
    xp = jnp.zeros((B_p, in_p), jnp.bfloat16).at[:B, :in_dim].set(
        x2.astype(jnp.bfloat16))

    # Whole-array, single-buffered VMEM residents for weights/biases.
    resident = pl.BlockSpec(memory_space=pltpu.MemorySpace.VMEM)

    flops = 2 * B_p * (in_p * d1_p + d1_p * d2_p + d2_p * out_p)
    bytes_accessed = (xp.size * 2
                      + (w1p.size + w2p.size + w3p.size) * 2
                      + (b1p.size + b2p.size + b3p.size) * 4
                      + B_p * out_p * out_bytes)

    # Footprint-derived scoped-VMEM cap, bounded by the per-generation budget.
    vmem_limit = int(min(vmem_budget, max(fp * 5 // 4, 16 * 1024 * 1024)))

    out_padded = pl.pallas_call(
        mlp_kernel,
        out_shape=jax.ShapeDtypeStruct((B_p, out_p), out_dtype),
        grid=grid,
        in_specs=[pl.BlockSpec((tile_b, in_p), lambda i: (i, 0)),
                  resident, resident,   # w1, b1
                  resident, resident,   # w2, b2
                  resident, resident],  # w3, b3
        out_specs=pl.BlockSpec((tile_b, out_p), lambda i: (i, 0)),
        compiler_params=pltpu.CompilerParams(
            dimension_semantics=("parallel",),
            vmem_limit_bytes=vmem_limit),
        cost_estimate=pl.CostEstimate(flops=flops, transcendentals=0,
                                      bytes_accessed=bytes_accessed),
    )(xp, w1p, b1p, w2p, b2p, w3p, b3p)

    return out_padded[:B, :out_dim]


def init_mlp_params(key, input_dim, output_dim, dim, n_blk=3):
    """Deterministic init mimicking nn.Linear defaults (uniform +-1/sqrt(fan_in)).

    Weights are stored as (in, out) so the kernel computes y = x @ W + b.
    """
    assert n_blk == 3, "this script instantiates the default 3-block MLP"
    dims = [(input_dim, dim), (dim, dim), (dim, output_dim)]
    params = []
    for (fan_in, fan_out) in dims:
        key, kw, kb = jax.random.split(key, 3)
        bound = 1.0 / jnp.sqrt(fan_in)
        w = jax.random.uniform(kw, (fan_in, fan_out), jnp.float32, -bound, bound)
        b = jax.random.uniform(kb, (1, fan_out), jnp.float32, -bound, bound)
        params.append((w, b))
    return params


def mlp_reference(x, params):
    """Pure-JAX f32 reference of the same forward pass (for correctness)."""
    B = x.shape[0]
    h = x.reshape(B, -1)
    (w1, b1), (w2, b2), (w3, b3) = params
    h = jnp.maximum(h @ w1 + b1, 0.0)
    h = jnp.maximum(h @ w2 + b2, 0.0)
    return h @ w3 + b3


if __name__ == "__main__":
    key = jax.random.PRNGKey(0)

    # --- small demo consistent with the module: style-code-like NCHW input ---
    B, C, H, W = 2, 16, 1, 1
    input_dim, dim, output_dim, n_blk = C * H * W, 32, 8, 3

    key, kx = jax.random.split(key)
    x = jax.random.normal(kx, (B, C, H, W), dtype=jnp.float32)
    params = init_mlp_params(key, input_dim, output_dim, dim, n_blk)
    padded, dims = prepare_mlp_params(params)

    fwd = jax.jit(lambda xx: mlp_forward(xx, padded, dims, force_pallas=True))
    out = fwd(x)
    jax.block_until_ready(out)
    assert out.shape == (B, output_dim), out.shape
    ref = mlp_reference(x, params)
    assert jnp.allclose(out, ref, rtol=5e-2, atol=5e-2), (
        float(jnp.max(jnp.abs(out - ref))))

    # --- second check: exercises row/lane padding, footprint-based tile pick
    #     and a >=2-step grid (megacore split on v7x) ---
    B2, in2, dim2, out2 = 48, 192, 256, 160
    key, kx2, kp2 = jax.random.split(key, 3)
    x_big = jax.random.normal(kx2, (B2, in2), dtype=jnp.float32)
    params2 = init_mlp_params(kp2, in2, out2, dim2, 3)
    padded2, dims2 = prepare_mlp_params(params2)
    fwd2 = jax.jit(lambda xx: mlp_forward(xx, padded2, dims2, force_pallas=True))
    out2_arr = fwd2(x_big)
    jax.block_until_ready(out2_arr)
    assert out2_arr.shape == (B2, out2), out2_arr.shape
    ref2 = mlp_reference(x_big, params2)
    assert jnp.allclose(out2_arr, ref2, rtol=5e-2, atol=5e-2), (
        float(jnp.max(jnp.abs(out2_arr - ref2))))

    print("KERNEL_OK")
</pallas_src>

<mosaic_0001>
module attributes {stable_mosaic.version = 11 : i64} {
  func.func @mlp_kernel(%arg0: i32, %arg1: memref<16x128xbf16, #tpu.memory_space<vmem>>, %arg2: memref<128x128xbf16, #tpu.memory_space<vmem>>, %arg3: memref<1x128xf32, #tpu.memory_space<vmem>>, %arg4: memref<128x128xbf16, #tpu.memory_space<vmem>>, %arg5: memref<1x128xf32, #tpu.memory_space<vmem>>, %arg6: memref<128x128xbf16, #tpu.memory_space<vmem>>, %arg7: memref<1x128xf32, #tpu.memory_space<vmem>>, %arg8: memref<16x128xf32, #tpu.memory_space<vmem>>) attributes {dimension_semantics = [#tpu.dimension_semantics<parallel>], iteration_bounds = array<i64: 1>, scalar_prefetch = 0 : i64, scratch_operands = 0 : i64, tpu.core_type = #tpu.core_type<tc>, window_params = [{transform_indices = @transform_0, window_bounds = array<i64: 16, 128>}, {pipeline_mode = #tpu.pipeline_mode<synchronous>, transform_indices = @transform_1, window_bounds = array<i64: 128, 128>}, {pipeline_mode = #tpu.pipeline_mode<synchronous>, transform_indices = @transform_2, window_bounds = array<i64: 1, 128>}, {pipeline_mode = #tpu.pipeline_mode<synchronous>, transform_indices = @transform_3, window_bounds = array<i64: 128, 128>}, {pipeline_mode = #tpu.pipeline_mode<synchronous>, transform_indices = @transform_4, window_bounds = array<i64: 1, 128>}, {pipeline_mode = #tpu.pipeline_mode<synchronous>, transform_indices = @transform_5, window_bounds = array<i64: 128, 128>}, {pipeline_mode = #tpu.pipeline_mode<synchronous>, transform_indices = @transform_6, window_bounds = array<i64: 1, 128>}, {transform_indices = @transform_7, window_bounds = array<i64: 16, 128>}]} {
    %c0 = arith.constant 0 : index
    %c0_0 = arith.constant 0 : index
    %0 = vector.load %arg1[%c0, %c0_0] : memref<16x128xbf16, #tpu.memory_space<vmem>>, vector<16x128xbf16>
    %c0_1 = arith.constant 0 : index
    %c0_2 = arith.constant 0 : index
    %1 = vector.load %arg2[%c0_1, %c0_2] : memref<128x128xbf16, #tpu.memory_space<vmem>>, vector<128x128xbf16>
    %cst = arith.constant dense<0.000000e+00> : vector<16x128xf32>
    %2 = tpu.matmul %0, %1, %cst {dimension_numbers = #tpu.dot_dimension_numbers<[1], [0], [0], [1], [0, 0, 1, 1], [], []>} : vector<16x128xbf16>, vector<128x128xbf16>, vector<16x128xf32> -> vector<16x128xf32>
    %c0_3 = arith.constant 0 : index
    %c0_4 = arith.constant 0 : index
    %3 = vector.load %arg3[%c0_3, %c0_4] : memref<1x128xf32, #tpu.memory_space<vmem>>, vector<1x128xf32>
    %4 = vector.broadcast %3 : vector<1x128xf32> to vector<16x128xf32>
    %5 = arith.addf %2, %4 : vector<16x128xf32>
    %cst_5 = arith.constant 0.000000e+00 : f32
    %6 = vector.broadcast %cst_5 : f32 to vector<16x128xf32>
    %7 = arith.maximumf %5, %6 : vector<16x128xf32>
    %8 = arith.truncf %7 : vector<16x128xf32> to vector<16x128xbf16>
    %c0_6 = arith.constant 0 : index
    %c0_7 = arith.constant 0 : index
    %9 = vector.load %arg4[%c0_6, %c0_7] : memref<128x128xbf16, #tpu.memory_space<vmem>>, vector<128x128xbf16>
    %cst_8 = arith.constant dense<0.000000e+00> : vector<16x128xf32>
    %10 = tpu.matmul %8, %9, %cst_8 {dimension_numbers = #tpu.dot_dimension_numbers<[1], [0], [0], [1], [0, 0, 1, 1], [], []>} : vector<16x128xbf16>, vector<128x128xbf16>, vector<16x128xf32> -> vector<16x128xf32>
    %c0_9 = arith.constant 0 : index
    %c0_10 = arith.constant 0 : index
    %11 = vector.load %arg5[%c0_9, %c0_10] : memref<1x128xf32, #tpu.memory_space<vmem>>, vector<1x128xf32>
    %12 = vector.broadcast %11 : vector<1x128xf32> to vector<16x128xf32>
    %13 = arith.addf %10, %12 : vector<16x128xf32>
    %cst_11 = arith.constant 0.000000e+00 : f32
    %14 = vector.broadcast %cst_11 : f32 to vector<16x128xf32>
    %15 = arith.maximumf %13, %14 : vector<16x128xf32>
    %16 = arith.truncf %15 : vector<16x128xf32> to vector<16x128xbf16>
    %c0_12 = arith.constant 0 : index
    %c0_13 = arith.constant 0 : index
    %17 = vector.load %arg6[%c0_12, %c0_13] : memref<128x128xbf16, #tpu.memory_space<vmem>>, vector<128x128xbf16>
    %cst_14 = arith.constant dense<0.000000e+00> : vector<16x128xf32>
    %18 = tpu.matmul %16, %17, %cst_14 {dimension_numbers = #tpu.dot_dimension_numbers<[1], [0], [0], [1], [0, 0, 1, 1], [], []>} : vector<16x128xbf16>, vector<128x128xbf16>, vector<16x128xf32> -> vector<16x128xf32>
    %c0_15 = arith.constant 0 : index
    %c0_16 = arith.constant 0 : index
    %19 = vector.load %arg7[%c0_15, %c0_16] : memref<1x128xf32, #tpu.memory_space<vmem>>, vector<1x128xf32>
    %20 = vector.broadcast %19 : vector<1x128xf32> to vector<16x128xf32>
    %21 = arith.addf %18, %20 : vector<16x128xf32>
    %c0_17 = arith.constant 0 : index
    %c0_18 = arith.constant 0 : index
    %22 = vector.load %arg8[%c0_17, %c0_18] : memref<16x128xf32, #tpu.memory_space<vmem>>, vector<16x128xf32>
    tpu.vector_store %arg8[%c0_17, %c0_18], %21 {strides = array<i32>} : memref<16x128xf32, #tpu.memory_space<vmem>>, vector<16x128xf32>,
    return
  }
  func.func @transform_0(%arg0: i32) -> (i32, i32) {
    %c0_i32 = arith.constant 0 : i32
    %c0_i32_0 = arith.constant 0 : i32
    return %arg0, %c0_i32 : i32, i32
  }
  func.func @transform_1(%arg0: i32) -> (i32, i32) {
    %c0_i32 = arith.constant 0 : i32
    %c0_i32_0 = arith.constant 0 : i32
    %c0_i32_1 = arith.constant 0 : i32
    return %c0_i32, %c0_i32_0 : i32, i32
  }
  func.func @transform_2(%arg0: i32) -> (i32, i32) {
    %c0_i32 = arith.constant 0 : i32
    %c0_i32_0 = arith.constant 0 : i32
    %c0_i32_1 = arith.constant 0 : i32
    return %c0_i32, %c0_i32_0 : i32, i32
  }
  func.func @transform_3(%arg0: i32) -> (i32, i32) {
    %c0_i32 = arith.constant 0 : i32
    %c0_i32_0 = arith.constant 0 : i32
    %c0_i32_1 = arith.constant 0 : i32
    return %c0_i32, %c0_i32_0 : i32, i32
  }
  func.func @transform_4(%arg0: i32) -> (i32, i32) {
    %c0_i32 = arith.constant 0 : i32
    %c0_i32_0 = arith.constant 0 : i32
    %c0_i32_1 = arith.constant 0 : i32
    return %c0_i32, %c0_i32_0 : i32, i32
  }
  func.func @transform_5(%arg0: i32) -> (i32, i32) {
    %c0_i32 = arith.constant 0 : i32
    %c0_i32_0 = arith.constant 0 : i32
    %c0_i32_1 = arith.constant 0 : i32
    return %c0_i32, %c0_i32_0 : i32, i32
  }
  func.func @transform_6(%arg0: i32) -> (i32, i32) {
    %c0_i32 = arith.constant 0 : i32
    %c0_i32_0 = arith.constant 0 : i32
    %c0_i32_1 = arith.constant 0 : i32
    return %c0_i32, %c0_i32_0 : i32, i32
  }
  func.func @transform_7(%arg0: i32) -> (i32, i32) {
    %c0_i32 = arith.constant 0 : i32
    %c0_i32_0 = arith.constant 0 : i32
    return %arg0, %c0_i32 : i32, i32
  }
}

</mosaic_0001>

<bundles_post_ra>
// kernel: _lambda_.1
= control target key start
LH: loop header
LB: loop body
LE: loop exit
PB: predicated region body
PF: predicated region fallthrough
CT: control target
= control target key end

     0   :  { %12 = vsyncpa [#allocation3], 0  ;;  %s741_s0 = inlined_call_operand.vmem [shape: bf16[16,128], index: 0, kind: input, shape index: {}]   ;;  %s742_s1 = inlined_call_operand.hbm [shape: bf16[128,128], index: 1, kind: input, shape index: {}]   ;;  %s743_s2 = inlined_call_operand.vmem [shape: f32[1,128], index: 2, kind: input, shape index: {}]   ;;  %s744_s3 = inlined_call_operand.hbm [shape: bf16[128,128], index: 3, kind: input, shape index: {}]   ;;  %s745_s4 = inlined_call_operand.vmem [shape: f32[1,128], index: 4, kind: input, shape index: {}]   ;;  %s746_s5 = inlined_call_operand.hbm [shape: bf16[128,128], index: 5, kind: input, shape index: {}]   ;;  %s747_s6 = inlined_call_operand.vmem [shape: f32[1,128], index: 6, kind: input, shape index: {}]   ;;  %s748_s7 = inlined_call_operand.vmem [shape: f32[16,128], index: 7, kind: output, shape index: {}]  }
   0x1   :  { %13 = vsyncpa [#allocation5], 0  ;;  %s637_s24 = smov [#allocation4]   ;;  %s638_s26 = smov [#allocation2]  }
   0x2   :  { %s35_s25 = sshll.u32 %s637_s24, 4  ;;  %s21_s27 = sshll.u32 %s638_s26, 4  ;;  %s36_s25 = int_to_ptr.vmem [resolvable:$true] %s35_s25  ;;  %s22_s27 = int_to_ptr.vmem [resolvable:$true] %s21_s27 }
   0x3   :  { %s581_s28 = scalar_lea.vmem %s36_s25, 1024  ;;  %p586_p1 = scmp.lt.s32.totalorder %s36_s25, %s36_s25 }
   0x4   :  { %p582_p0 = scmp.ne.s32.totalorder %s36_s25, %s581_s28  ;;  %p587_p2 = scmp.lt.s32.totalorder %s581_s28, %s581_s28 }
   0x6   :  { %p588_p3 = por %p587_p2, %p586_p1 }
   0x8   :  { %p589_p4 = pnand %p588_p3, %p582_p0 }
   0xa   :  { %592 = shalt.err (!%p589_p4)
}
   0xb   :  { %s639_s29 = smov 64   ;;  %s640_s30 = smov 4  }
   0xc   :  { %41 = dma.hbm_to_vmem [thread:$0]  %s744_s3, 1024, %s36_s25, [#allocation5], %s639_s29, %s639_s29, %s640_s30  }
   0xd   :  { %s601_s10 = scalar_lea.vmem %s22_s27, 1024  ;;  %p606_p6 = scmp.lt.s32.totalorder %s22_s27, %s22_s27 }
   0xe   :  { %p602_p5 = scmp.ne.s32.totalorder %s22_s27, %s601_s10  ;;  %p607_p7 = scmp.lt.s32.totalorder %s601_s10, %s601_s10 }
  0x10   :  { %p608_p8 = por %p607_p7, %p606_p6 }
  0x12   :  { %p609_p9 = pnand %p608_p8, %p602_p5 }
  0x14   :  { %612 = shalt.err (!%p609_p9)
}
  0x15   :  { %27 = dma.hbm_to_vmem [thread:$0]  %s742_s1, 1024, %s22_s27, [#allocation3], %s639_s29, %s639_s29, %s640_s30  }
  0x16   :  { %s641_s13 = smov [#allocation6]  }
  0x17   :  { %s49_s14 = sshll.u32 %s641_s13, 4  ;;  %s50_s14 = int_to_ptr.vmem [resolvable:$true] %s49_s14 }
  0x18   :  { %s621_s15 = scalar_lea.vmem %s50_s14, 1024  ;;  %p626_p11 = scmp.lt.s32.totalorder %s50_s14, %s50_s14 }
  0x19   :  { %p622_p10 = scmp.ne.s32.totalorder %s50_s14, %s621_s15  ;;  %p627_p12 = scmp.lt.s32.totalorder %s621_s15, %s621_s15 }
  0x1b   :  { %p628_p13 = por %p627_p12, %p626_p11 }
  0x1d   :  { %p629_p0 = pnand %p628_p13, %p622_p10 }
  0x1f   :  { %632 = shalt.err (!%p629_p0)
}
  0x20   :  { %55 = dma.hbm_to_vmem [thread:$0]  %s746_s5, 1024, %s50_s14, [#allocation5], %s639_s29, %s639_s29, %s640_s30  }
  0x21   :  { %633 = dma.done.wait [#allocation3], 1024  }
  0x22   :  { %634 = vsyncadd [#allocation3], 4294966272 }
  0x23   :  { %635 = dma.done.wait [#allocation5], 2048  }
  0x24   :  { %636 = vsyncadd [#allocation5], 4294965248  ;;  %v642_v0 = vmov 0.0   ;;  %vm643_vm0 = vmmov 0   ;;  %v548_v1 = vld [vmem:[#allocation2 + $0x38] sm:$0xff]   ;;  %v549_v2 = vld [vmem:[#allocation2 + $0x30] sm:$0xff]  }
  0x25   :  { %481 = vmatprep.subr.bf16.mxu0 %v642_v0  ;;  %497 = vmatprep.mubr.msk.bf16.mxu0 %vm643_vm0, %v642_v0  ;;  %v550_v3 = vld [vmem:[#allocation2 + $0x28] sm:$0xff]   ;;  %v557_v4 = vld [vmem:[#allocation4 + $0x38] sm:$0xff]   ;;  %v551_v5 = vld [vmem:[#allocation2 + $0x20] sm:$0xff]  }
  0x26   :  { %501 = vmatprep.subr.bf16.mxu1 %v642_v0  ;;  %517 = vmatprep.mubr.msk.bf16.mxu1 %vm643_vm0, %v642_v0  ;;  %v558_v6 = vld [vmem:[#allocation4 + $0x30] sm:$0xff]   ;;  %v552_v7 = vld [vmem:[#allocation2 + $0x18] sm:$0xff]   ;;  %v559_v8 = vld [vmem:[#allocation4 + $0x28] sm:$0xff]  }
  0x27   :  { %482 = vmatpush3.bf16.msra.mxu0 %v548_v1  ;;  %502 = vmatpush3.bf16.msra.mxu1 %v557_v4  ;;  %v553_v9 = vld [vmem:[#allocation2 + $0x10] sm:$0xff]   ;;  %v560_v10 = vld [vmem:[#allocation4 + $0x20] sm:$0xff]   ;;  %v554_v11 = vld [vmem:[#allocation2 + $0x8] sm:$0xff]  }
  0x28   :  { %483 = vmatprep.subr.bf16.mxu0 %v642_v0  ;;  %503 = vmatprep.subr.bf16.mxu1 %v642_v0  ;;  %v561_v12 = vld [vmem:[#allocation4 + $0x18] sm:$0xff]   ;;  %v555_v13 = vld [vmem:[#allocation2] sm:$0xff]   ;;  %v562_v15 = vld [vmem:[#allocation4 + $0x10] sm:$0xff]  }
  0x29   :  { %v556_v14 = vld [vmem:[%s741_s0] sm:$0xff]   ;;  %v563_v16 = vld [vmem:[#allocation4 + $0x8] sm:$0xff]   ;;  %v565_v18 = vld [vmem:[#allocation6 + $0x38] sm:$0xff]  }
  0x2a   :  { %v564_v17 = vld [vmem:[#allocation4] sm:$0xff]   ;;  %v566_v19 = vld [vmem:[#allocation6 + $0x30] sm:$0xff]   ;;  %v567_v20 = vld [vmem:[#allocation6 + $0x28] sm:$0xff]  }
  0x2b   :  { %484 = vmatpush3.bf16.msra.mxu0 %v549_v2  ;;  %504 = vmatpush3.bf16.msra.mxu1 %v558_v6  ;;  %v568_v21 = vld [vmem:[#allocation6 + $0x20] sm:$0xff]   ;;  %v569_v22 = vld [vmem:[#allocation6 + $0x18] sm:$0xff]   ;;  %v570_v33 = vld [vmem:[#allocation6 + $0x10] sm:$0xff]  }
  0x2c   :  { %485 = vmatprep.subr.bf16.mxu0 %v642_v0  ;;  %505 = vmatprep.subr.bf16.mxu1 %v642_v0  ;;  %v426_v23 = vld [vmem:[%s743_s2] ss:$0 sm:$0xff]  ;;  %v571_v34 = vld [vmem:[#allocation6 + $0x8] sm:$0xff]  }
  0x2d   :  { %v572_v35 = vld [vmem:[#allocation6] sm:$0xff]  }
  0x2e   :  { %v436_v36 = vld [vmem:[%s745_s4] ss:$0 sm:$0xff] }
  0x2f   :  { %486 = vmatpush3.bf16.msra.mxu0 %v550_v3  ;;  %506 = vmatpush3.bf16.msra.mxu1 %v559_v8  ;;  %v445_v46 = vld [vmem:[%s747_s6] ss:$0 sm:$0xff] }
  0x30   :  { %487 = vmatprep.subr.bf16.mxu0 %v642_v0  ;;  %507 = vmatprep.subr.bf16.mxu1 %v642_v0 }
  0x33   :  { %488 = vmatpush3.bf16.msra.mxu0 %v551_v5  ;;  %508 = vmatpush3.bf16.msra.mxu1 %v560_v10 }
  0x34   :  { %489 = vmatprep.subr.bf16.mxu0 %v642_v0  ;;  %509 = vmatprep.subr.bf16.mxu1 %v642_v0 }
  0x37   :  { %490 = vmatpush3.bf16.msra.mxu0 %v552_v7  ;;  %510 = vmatpush3.bf16.msra.mxu1 %v561_v12 }
  0x38   :  { %491 = vmatprep.subr.bf16.mxu0 %v642_v0  ;;  %511 = vmatprep.subr.bf16.mxu1 %v642_v0 }
  0x3b   :  { %492 = vmatpush3.bf16.msra.mxu0 %v553_v9  ;;  %512 = vmatpush3.bf16.msra.mxu1 %v562_v15 }
  0x3c   :  { %493 = vmatprep.subr.bf16.mxu0 %v642_v0  ;;  %513 = vmatprep.subr.bf16.mxu1 %v642_v0 }
  0x3f   :  { %494 = vmatpush3.bf16.msra.mxu0 %v554_v11  ;;  %514 = vmatpush3.bf16.msra.mxu1 %v563_v16 }
  0x40   :  { %495 = vmatprep.subr.bf16.mxu0 %v642_v0  ;;  %515 = vmatprep.subr.bf16.mxu1 %v642_v0 }
  0x43   :  { %496 = vmatpush3.bf16.msra.mxu0 %v555_v13  ;;  %516 = vmatpush3.bf16.msra.mxu1 %v564_v17 }
  0x44   :  { %521 = vmatprep.subr.bf16.mxu0 %v642_v0 }
  0x46   :  { %498 = vmatmul.mubr.bf16.vlgmr.msra.gmra.mxu0 %v556_v14 }
  0x47   :  { %537 = vmatprep.mubr.msk.bf16.mxu0 %vm643_vm0, %v642_v0  ;;  %522 = vmatpush3.bf16.msra.mxu0 %v565_v18 }
  0x48   :  { %523 = vmatprep.subr.bf16.mxu0 %v642_v0 }
  0x4b   :  { %524 = vmatpush3.bf16.msra.mxu0 %v566_v19 }
  0x4c   :  { %525 = vmatprep.subr.bf16.mxu0 %v642_v0 }
  0x4f   :  { %526 = vmatpush3.bf16.msra.mxu0 %v567_v20 }
  0x50   :  { %527 = vmatprep.subr.bf16.mxu0 %v642_v0 }
  0x53   :  { %528 = vmatpush3.bf16.msra.mxu0 %v568_v21 }
  0x54   :  { %529 = vmatprep.subr.bf16.mxu0 %v642_v0 }
  0x57   :  { %530 = vmatpush3.bf16.msra.mxu0 %v569_v22 }
  0x58   :  { %531 = vmatprep.subr.bf16.mxu0 %v642_v0 }
  0x5b   :  { %532 = vmatpush3.bf16.msra.mxu0 %v570_v33 }
  0x5c   :  { %533 = vmatprep.subr.bf16.mxu0 %v642_v0 }
  0x5f   :  { %534 = vmatpush3.bf16.msra.mxu0 %v571_v34 }
  0x60   :  { %535 = vmatprep.subr.bf16.mxu0 %v642_v0 }
  0x63   :  { %536 = vmatpush3.bf16.msra.mxu0 %v572_v35 }
 0x106   :  { %v181_v24 = vpop.f32.mrf.mxu0 }
 0x107   :  { %v182_v26 = vadd.f32 %v426_v23, %v181_v24 }
 0x108   :  { %v499_v25 = vpop.f32.mrf.mxu0 }
 0x109   :  { %v188_v30 = vmax.f32 %v182_v26, 0.0 }
 0x10a   :  { %v184_v27 = vpop.f32.mrf.mxu0 }
 0x10b   :  { %v185_v28 = vadd.f32 %v426_v23, %v184_v27 }
 0x10c   :  { %v500_v29 = vpop.f32.mrf.mxu0 }
 0x10d   :  { %v189_v31 = vmax.f32 %v185_v28, 0.0 }
 0x10f   :  { %v190_v32 = vpack.c.bf16 %v189_v31, %v188_v30 }
 0x111   :  { %518 = vmatmul.mubr.bf16.vlgmr.msra.gmra.mxu1 %v190_v32 }
 0x1d1   :  { %v296_v37 = vpop.f32.mrf.mxu1 }
 0x1d2   :  { %v297_v39 = vadd.f32 %v436_v36, %v296_v37 }
 0x1d3   :  { %v519_v38 = vpop.f32.mrf.mxu1 }
 0x1d4   :  { %v303_v43 = vmax.f32 %v297_v39, 0.0 }
 0x1d5   :  { %v299_v40 = vpop.f32.mrf.mxu1 }
 0x1d6   :  { %v300_v41 = vadd.f32 %v436_v36, %v299_v40 }
 0x1d7   :  { %v520_v42 = vpop.f32.mrf.mxu1 }
 0x1d8   :  { %v304_v44 = vmax.f32 %v300_v41, 0.0 }
 0x1da   :  { %v305_v45 = vpack.c.bf16 %v304_v44, %v303_v43 }
 0x1dc   :  { %538 = vmatmul.mubr.bf16.vlgmr.msra.gmra.mxu0 %v305_v45 }
 0x29c   :  { %v411_v47 = vpop.f32.mrf.mxu0 }
 0x29d   :  { %v412_v48 = vadd.f32 %v445_v46, %v411_v47 }
 0x29e   :  { %v539_v49 = vpop.f32.mrf.mxu0 }
 0x29f   :  { %418 = vst [vmem:[%s748_s7] sm:$0xff] %v412_v48 }
 0x2a0   :  { %v414_v50 = vpop.f32.mrf.mxu0 }
 0x2a1   :  { %v415_v51 = vadd.f32 %v445_v46, %v414_v50 }
 0x2a2   :  { %v540_v52 = vpop.f32.mrf.mxu0 }
 0x2a3   :  { %419 = vst [vmem:[%s748_s7 + $0x8] sm:$0xff] %v415_v51 }
 0x2a4   :  { %424 = vsyncpa [#allocation3], 1 }
 0x2a5   :  { %425 = vsyncpa [#allocation5], 1 }

</bundles_post_ra>
